<compile_context>
chip_gen: v5e
topology: v5e:2x2
jax: 0.10.0
libtpu: 0.0.40
codegen_flags: <defaults>
</compile_context>

<pallas_src>
import jax
import jax.numpy as jnp
from jax import lax
from jax.experimental import pallas as pl
from jax.experimental.pallas import tpu as pltpu


_ROWS_PER_STEP = 64       # 8 slabs x 8 rows, statically unrolled per fori iteration
_XLA_FALLBACK_N = 8192    # above this, use the O(N log N) sort-based XLA path


def _vfa_counts_kernel(col_ref, row_ref, out_ref):
    """Equality counts for one column tile, reduced over all rows in-kernel.

    col_ref: (1, TN)     f32 values of the column nodes (lane axis).
    row_ref: (n_pad, 1)  f32 values of all nodes (resident; sublane axis).
    out_ref: (8, TN)     f32 partial sums; row s holds contributions from rows
                         congruent to s (mod 8).  Folded over axis 0 outside.
    """
    tn = out_ref.shape[1]
    n_rows = row_ref.shape[0]

    # Hoist the (1, TN) -> (8, TN) sublane broadcast out of the hot loop
    # (JAX does not CSE broadcast_in_dim inside loop bodies).
    col8 = jnp.broadcast_to(col_ref[...], (8, tn))

    def body(it, acc):
        base = pl.multiple_of(it * _ROWS_PER_STEP, _ROWS_PER_STEP)
        # Statically unrolled 8-row slabs: compare + convert + add only (VPU),
        # accumulator stays in vregs — no big eq intermediate, no spills.
        for s in range(_ROWS_PER_STEP // 8):
            rows = row_ref[pl.ds(base + s * 8, 8), :]             # (8, 1)
            acc = acc + (rows == col8).astype(jnp.float32)        # (8, TN)
        return acc

    acc0 = jnp.zeros((8, tn), jnp.float32)
    out_ref[...] = lax.fori_loop(0, n_rows // _ROWS_PER_STEP, body, acc0)


def _round_up(x, m):
    return ((x + m - 1) // m) * m


def _counts_pallas(x):
    """Pairwise-equality counts via the Pallas kernel. x: f32[n] -> f32[n]."""
    n = x.shape[0]
    n_pad = _round_up(max(n, 128), 128)
    # TN multiple of 128 (lane-dense output); keep grid[0] >= 2 when possible
    # so both v7x TensorCores get work.  VMEM footprint is dominated by the
    # resident (n_pad, 1) row block: n_pad/8 * 4 KiB <= 4 MiB at n_pad = 8192,
    # comfortably under the scoped-VMEM default on v5e/v6e/v7x.
    tn = 128 if n_pad <= 512 else 512
    n_pad = _round_up(n_pad, tn)

    pad = n_pad - n
    if pad:
        # NaN never equals anything (even itself): padded entries add 0 to
        # every count and receive count 0 themselves.
        x = jnp.pad(x, (0, pad), constant_values=float("nan"))

    col = x.reshape(1, n_pad)    # lane axis    = column node j
    row = x.reshape(n_pad, 1)    # sublane axis = row node i (resident)

    grid = (n_pad // tn,)        # parallel over column tiles only

    counts8 = pl.pallas_call(
        _vfa_counts_kernel,
        out_shape=jax.ShapeDtypeStruct((8, n_pad), jnp.float32),
        grid=grid,
        in_specs=[
            pl.BlockSpec((1, tn), lambda j: (0, j)),       # column values
            pl.BlockSpec((n_pad, 1), lambda j: (0, 0)),    # all rows, resident
        ],
        out_specs=pl.BlockSpec((8, tn), lambda j: (0, j)),
        compiler_params=pltpu.CompilerParams(
            dimension_semantics=("parallel",),
        ),
    )(col, row)

    # Fold the 8 partial-sum rows (O(8N), done at HBM roofline in XLA).
    return jnp.sum(counts8, axis=0)[:n]


def _counts_via_sort(x):
    """O(N log N) sort + segment-count path for large N (plain XLA)."""
    n = x.shape[0]
    order = jnp.argsort(x)
    xs = x[order]
    new_run = jnp.concatenate(
        [jnp.ones((1,), jnp.int32), (xs[1:] != xs[:-1]).astype(jnp.int32)]
    )
    run_id = jnp.cumsum(new_run) - 1                       # run index per sorted elem
    run_counts = jnp.zeros((n,), jnp.float32).at[run_id].add(1.0)
    counts_sorted = run_counts[run_id]
    return jnp.zeros((n,), jnp.float32).at[order].set(counts_sorted)


def value_frequency_attention(node_values, *, xla_fallback_threshold=_XLA_FALLBACK_N):
    """node_values: float array of shape [num_nodes] -> float32 [num_nodes]."""
    n = node_values.shape[0]
    x = node_values.astype(jnp.float32)

    if n > xla_fallback_threshold:
        counts = _counts_via_sort(x)        # O(N log N) beats the N^2 kernel
    else:
        counts = _counts_pallas(x)

    freq = counts / jnp.max(counts)
    return jnp.clip(freq, 0.0, 1.0)


def _reference(node_values):
    """Pure-JAX reference mirroring the PyTorch forward."""
    x = node_values.astype(jnp.float32)
    counts = jnp.sum((x[:, None] == x[None, :]).astype(jnp.float32), axis=1)
    freq = counts / jnp.max(counts)
    return jnp.clip(freq, 0.0, 1.0)


if __name__ == "__main__":
    key = jax.random.PRNGKey(0)

    # Case 1: N a multiple of 128 (no padding path).
    n1 = 128
    vals1 = jax.random.randint(key, (n1,), 0, 8).astype(jnp.float32)
    out1 = jax.block_until_ready(value_frequency_attention(vals1))
    ref1 = _reference(vals1)
    assert out1.shape == (n1,) and out1.dtype == jnp.float32
    assert bool(jnp.allclose(out1, ref1, atol=1e-6)), "mismatch (n=128)"

    # Case 2: N not a multiple of 128 (exercises the NaN-padding path).
    n2 = 200
    vals2 = jax.random.randint(jax.random.PRNGKey(1), (n2,), 0, 5).astype(jnp.float32)
    out2 = jax.block_until_ready(value_frequency_attention(vals2))
    ref2 = _reference(vals2)
    assert out2.shape == (n2,) and out2.dtype == jnp.float32
    assert bool(jnp.allclose(out2, ref2, atol=1e-6)), "mismatch (n=200)"

    # Case 3: exercise the large-N sort-based XLA fallback on a small input.
    n3 = 64
    vals3 = jax.random.randint(jax.random.PRNGKey(2), (n3,), 0, 6).astype(jnp.float32)
    out3 = jax.block_until_ready(
        value_frequency_attention(vals3, xla_fallback_threshold=0)
    )
    ref3 = _reference(vals3)
    assert bool(jnp.allclose(out3, ref3, atol=1e-6)), "mismatch (fallback)"

    print("KERNEL_OK")
</pallas_src>

<mosaic_0001>
module attributes {stable_mosaic.version = 11 : i64} {
  func.func @_vfa_counts_kernel(%arg0: i32, %arg1: memref<1x128xf32, #tpu.memory_space<vmem>>, %arg2: memref<128x1xf32, #tpu.memory_space<vmem>>, %arg3: memref<8x128xf32, #tpu.memory_space<vmem>>) attributes {dimension_semantics = [#tpu.dimension_semantics<parallel>], iteration_bounds = array<i64: 1>, scalar_prefetch = 0 : i64, scratch_operands = 0 : i64, tpu.core_type = #tpu.core_type<tc>, window_params = [{transform_indices = @transform_0, window_bounds = array<i64: 1, 128>}, {pipeline_mode = #tpu.pipeline_mode<synchronous>, transform_indices = @transform_1, window_bounds = array<i64: 128, 1>}, {transform_indices = @transform_2, window_bounds = array<i64: 8, 128>}]} {
    %c0 = arith.constant 0 : index
    %c0_0 = arith.constant 0 : index
    %0 = vector.load %arg1[%c0, %c0_0] : memref<1x128xf32, #tpu.memory_space<vmem>>, vector<1x128xf32>
    %1 = vector.shape_cast %0 : vector<1x128xf32> to vector<1x128xf32>
    %2 = vector.broadcast %1 : vector<1x128xf32> to vector<8x128xf32>
    %cst = arith.constant 0.000000e+00 : f32
    %3 = vector.broadcast %cst : f32 to vector<8x128xf32>
    %c0_i32 = arith.constant 0 : i32
    %c2_i32 = arith.constant 2 : i32
    %4 = arith.addi %c0_i32, %c2_i32 : i32
    %c1_i32 = arith.constant 1 : i32
    %5 = scf.for %arg4 = %c0_i32 to %4 step %c1_i32 iter_args(%arg5 = %3) -> (vector<8x128xf32>)  : i32 {
      %c64_i32 = arith.constant 64 : i32
      %7 = arith.muli %arg4, %c64_i32 : i32
      %8 = tpu.assume_multiple %7, 64 : i32
      %c0_i32_4 = arith.constant 0 : i32
      %9 = arith.addi %8, %c0_i32_4 : i32
      %10 = arith.index_cast %9 : i32 to index
      %c0_5 = arith.constant 0 : index
      %11 = vector.load %arg2[%10, %c0_5] : memref<128x1xf32, #tpu.memory_space<vmem>>, vector<8x1xf32>
      %12 = vector.broadcast %11 : vector<8x1xf32> to vector<8x128xf32>
      %13 = arith.cmpf oeq, %12, %2 : vector<8x128xf32>
      %14 = arith.extui %13 : vector<8x128xi1> to vector<8x128xi32>
      %15 = arith.sitofp %14 : vector<8x128xi32> to vector<8x128xf32>
      %16 = arith.addf %arg5, %15 : vector<8x128xf32>
      %c8_i32 = arith.constant 8 : i32
      %17 = arith.addi %8, %c8_i32 : i32
      %18 = arith.index_cast %17 : i32 to index
      %c0_6 = arith.constant 0 : index
      %19 = vector.load %arg2[%18, %c0_6] : memref<128x1xf32, #tpu.memory_space<vmem>>, vector<8x1xf32>
      %20 = vector.broadcast %19 : vector<8x1xf32> to vector<8x128xf32>
      %21 = arith.cmpf oeq, %20, %2 : vector<8x128xf32>
      %22 = arith.extui %21 : vector<8x128xi1> to vector<8x128xi32>
      %23 = arith.sitofp %22 : vector<8x128xi32> to vector<8x128xf32>
      %24 = arith.addf %16, %23 : vector<8x128xf32>
      %c16_i32 = arith.constant 16 : i32
      %25 = arith.addi %8, %c16_i32 : i32
      %26 = arith.index_cast %25 : i32 to index
      %c0_7 = arith.constant 0 : index
      %27 = vector.load %arg2[%26, %c0_7] : memref<128x1xf32, #tpu.memory_space<vmem>>, vector<8x1xf32>
      %28 = vector.broadcast %27 : vector<8x1xf32> to vector<8x128xf32>
      %29 = arith.cmpf oeq, %28, %2 : vector<8x128xf32>
      %30 = arith.extui %29 : vector<8x128xi1> to vector<8x128xi32>
      %31 = arith.sitofp %30 : vector<8x128xi32> to vector<8x128xf32>
      %32 = arith.addf %24, %31 : vector<8x128xf32>
      %c24_i32 = arith.constant 24 : i32
      %33 = arith.addi %8, %c24_i32 : i32
      %34 = arith.index_cast %33 : i32 to index
      %c0_8 = arith.constant 0 : index
      %35 = vector.load %arg2[%34, %c0_8] : memref<128x1xf32, #tpu.memory_space<vmem>>, vector<8x1xf32>
      %36 = vector.broadcast %35 : vector<8x1xf32> to vector<8x128xf32>
      %37 = arith.cmpf oeq, %36, %2 : vector<8x128xf32>
      %38 = arith.extui %37 : vector<8x128xi1> to vector<8x128xi32>
      %39 = arith.sitofp %38 : vector<8x128xi32> to vector<8x128xf32>
      %40 = arith.addf %32, %39 : vector<8x128xf32>
      %c32_i32 = arith.constant 32 : i32
      %41 = arith.addi %8, %c32_i32 : i32
      %42 = arith.index_cast %41 : i32 to index
      %c0_9 = arith.constant 0 : index
      %43 = vector.load %arg2[%42, %c0_9] : memref<128x1xf32, #tpu.memory_space<vmem>>, vector<8x1xf32>
      %44 = vector.broadcast %43 : vector<8x1xf32> to vector<8x128xf32>
      %45 = arith.cmpf oeq, %44, %2 : vector<8x128xf32>
      %46 = arith.extui %45 : vector<8x128xi1> to vector<8x128xi32>
      %47 = arith.sitofp %46 : vector<8x128xi32> to vector<8x128xf32>
      %48 = arith.addf %40, %47 : vector<8x128xf32>
      %c40_i32 = arith.constant 40 : i32
      %49 = arith.addi %8, %c40_i32 : i32
      %50 = arith.index_cast %49 : i32 to index
      %c0_10 = arith.constant 0 : index
      %51 = vector.load %arg2[%50, %c0_10] : memref<128x1xf32, #tpu.memory_space<vmem>>, vector<8x1xf32>
      %52 = vector.broadcast %51 : vector<8x1xf32> to vector<8x128xf32>
      %53 = arith.cmpf oeq, %52, %2 : vector<8x128xf32>
      %54 = arith.extui %53 : vector<8x128xi1> to vector<8x128xi32>
      %55 = arith.sitofp %54 : vector<8x128xi32> to vector<8x128xf32>
      %56 = arith.addf %48, %55 : vector<8x128xf32>
      %c48_i32 = arith.constant 48 : i32
      %57 = arith.addi %8, %c48_i32 : i32
      %58 = arith.index_cast %57 : i32 to index
      %c0_11 = arith.constant 0 : index
      %59 = vector.load %arg2[%58, %c0_11] : memref<128x1xf32, #tpu.memory_space<vmem>>, vector<8x1xf32>
      %60 = vector.broadcast %59 : vector<8x1xf32> to vector<8x128xf32>
      %61 = arith.cmpf oeq, %60, %2 : vector<8x128xf32>
      %62 = arith.extui %61 : vector<8x128xi1> to vector<8x128xi32>
      %63 = arith.sitofp %62 : vector<8x128xi32> to vector<8x128xf32>
      %64 = arith.addf %56, %63 : vector<8x128xf32>
      %c56_i32 = arith.constant 56 : i32
      %65 = arith.addi %8, %c56_i32 : i32
      %66 = arith.index_cast %65 : i32 to index
      %c0_12 = arith.constant 0 : index
      %67 = vector.load %arg2[%66, %c0_12] : memref<128x1xf32, #tpu.memory_space<vmem>>, vector<8x1xf32>
      %68 = vector.broadcast %67 : vector<8x1xf32> to vector<8x128xf32>
      %69 = arith.cmpf oeq, %68, %2 : vector<8x128xf32>
      %70 = arith.extui %69 : vector<8x128xi1> to vector<8x128xi32>
      %71 = arith.sitofp %70 : vector<8x128xi32> to vector<8x128xf32>
      %72 = arith.addf %64, %71 : vector<8x128xf32>
      scf.yield %72 : vector<8x128xf32>
    }
    %c2_i32_1 = arith.constant 2 : i32
    %c0_2 = arith.constant 0 : index
    %c0_3 = arith.constant 0 : index
    %6 = vector.load %arg3[%c0_2, %c0_3] : memref<8x128xf32, #tpu.memory_space<vmem>>, vector<8x128xf32>
    tpu.vector_store %arg3[%c0_2, %c0_3], %5 {strides = array<i32>} : memref<8x128xf32, #tpu.memory_space<vmem>>, vector<8x128xf32>,
    return
  }
  func.func @transform_0(%arg0: i32) -> (i32, i32) {
    %c0_i32 = arith.constant 0 : i32
    %c0_i32_0 = arith.constant 0 : i32
    return %c0_i32, %arg0 : i32, i32
  }
  func.func @transform_1(%arg0: i32) -> (i32, i32) {
    %c0_i32 = arith.constant 0 : i32
    %c0_i32_0 = arith.constant 0 : i32
    %c0_i32_1 = arith.constant 0 : i32
    return %c0_i32, %c0_i32_0 : i32, i32
  }
  func.func @transform_2(%arg0: i32) -> (i32, i32) {
    %c0_i32 = arith.constant 0 : i32
    %c0_i32_0 = arith.constant 0 : i32
    return %c0_i32, %arg0 : i32, i32
  }
}

</mosaic_0001>

<bundles_post_ra>
// kernel: tpu_custom_call.1
= control target key start
LH: loop header
LB: loop body
LE: loop exit
PB: predicated region body
PF: predicated region fallthrough
CT: control target
= control target key end

     0   :  { %7 = vsyncpa [#allocation3], 0  ;;  %v278_v1 = vmov 0.0   ;;  %s280_s11 = smov 0   ;;  %s306_s0 = inlined_call_operand.vmem [shape: f32[1,128], index: 0, kind: input, shape index: {}]   ;;  %s307_s1 = inlined_call_operand.vmem [shape: f32[128,1], index: 1, kind: input, shape index: {}]   ;;  %s308_s2 = inlined_call_operand.hbm [shape: f32[8,128], index: 2, kind: output, shape index: {}]  }
   0x1   :  { %v276_v0 = vld [vmem:[%s306_s0] ss:$0 sm:$0xff] }
   0x2 LB: > { %v255_v2 = vmov 0   ;;  %s167_s12 = sshll.u32 %s253_s11, 6  ;;  %v256_v14 = vmov 0.0   ;;  %s21_s11 = sadd.s32 1, %s253_s11   ;;  %s253_s11 = sphi %s280_s11, %s21_s11   ;;  %v249_v1 = vphi %v278_v1, %v309_v1  }
   0x3   : > { %211 = vset.pattern.permute.xlu1 %v255_v2  ;;  %210 = vset.pattern.permute.xlu0 %v255_v2  ;;  %s24_s14 = scalar_lea.vmem %s307_s1, %s167_s12  ;;  %p18_p0 = scmp.ge.s32.totalorder %s21_s11, 2  }
   0x4   : > { %212 = vset.pattern.permute.xlu2 %v255_v2  ;;  %v173_v3 = vld [vmem:[%s24_s14 + $0x10] sm:$0xff]  ;;  %v25_v4 = vld [vmem:[%s24_s14] sm:$0xff]  ;;  %v176_v6 = vld [vmem:[%s24_s14 + $0x18] sm:$0xff]  ;;  %s127_s17 = sshll.u32 (%p18_p0), %s308_s2, 4  ;;  %s257_s18 = smov (%p18_p0), [#allocation2]   ;;  %s128_s17 = int_to_ptr.hbm [resolvable:$true] %s127_s17 }
   0x5   : > { %52 = vperm.xlu1 %211, %v173_v3   ;;  %28 = vperm.xlu0 %210, %v25_v4   ;;  %v179_v5 = vld [vmem:[%s24_s14 + $0x20] sm:$0xff]  ;;  %v170_v7 = vld [vmem:[%s24_s14 + $0x8] sm:$0xff]  ;;  %v188_v9 = vld [vmem:[%s24_s14 + $0x38] sm:$0xff]  ;;  %s125_s19 = sshll.u32 (%p18_p0), %s257_s18, 4  ;;  %s126_s19 = int_to_ptr.vmem [resolvable:$true] %s125_s19 }
   0x6   : > { %76 = vperm.xlu2 %212, %v179_v5   ;;  %v182_v8 = vld [vmem:[%s24_s14 + $0x28] sm:$0xff]  ;;  %v185_v10 = vld [vmem:[%s24_s14 + $0x30] sm:$0xff] }
   0xd   : > { %64 = vperm.xlu1 %211, %v176_v6   ;;  %40 = vperm.xlu0 %210, %v170_v7  }
   0xe   : > { %88 = vperm.xlu2 %212, %v182_v8  }
  0x15   : > { %112 = vperm.xlu1 %211, %v188_v9   ;;  %100 = vperm.xlu0 %210, %v185_v10  }
  0x60   : > { %v77_v13 = vpop.permute.xlu2 %76 }
  0x61   : > { %vm79_vm4 = vcmp.eq.f32.partialorder %v77_v13, %v276_v0 }
  0x62   : > { %v180_v26 = vsel %vm79_vm4, 1.0, %v256_v14 }
  0x68   : > { %v89_v22 = vpop.permute.xlu2 %88 }
  0x69   : > { %vm91_vm5 = vcmp.eq.f32.partialorder %v89_v22, %v276_v0 }
  0x6a   : > { %v183_v30 = vsel %vm91_vm5, 1.0, %v256_v14 }
  0x77   : > { %v53_v11 = vpop.permute.xlu1 %52  ;;  %v29_v12 = vpop.permute.xlu0 %28 }
  0x78   : > { %vm31_vm0 = vcmp.eq.f32.partialorder %v29_v12, %v276_v0  ;;  %vm55_vm1 = vcmp.eq.f32.partialorder %v53_v11, %v276_v0 }
  0x79   : > { %v168_v15 = vsel %vm31_vm0, 1.0, %v256_v14  ;;  %v174_v21 = vsel %vm55_vm1, 1.0, %v256_v14 }
  0x7a   : > { %v34_v18 = vadd.f32 %v249_v1, %v168_v15 }
  0x7f   : > { %v65_v16 = vpop.permute.xlu1 %64  ;;  %v41_v17 = vpop.permute.xlu0 %40 }
  0x80   : > { %vm43_vm2 = vcmp.eq.f32.partialorder %v41_v17, %v276_v0  ;;  %vm67_vm3 = vcmp.eq.f32.partialorder %v65_v16, %v276_v0 }
  0x81   : > { %v171_v19 = vsel %vm43_vm2, 1.0, %v256_v14  ;;  %v177_v24 = vsel %vm67_vm3, 1.0, %v256_v14 }
  0x82   : > { %v46_v20 = vadd.f32 %v171_v19, %v34_v18 }
  0x84   : > { %v58_v23 = vadd.f32 %v174_v21, %v46_v20 }
  0x86   : > { %v70_v25 = vadd.f32 %v177_v24, %v58_v23 }
  0x87   : > { %v113_v27 = vpop.permute.xlu1 %112  ;;  %v101_v28 = vpop.permute.xlu0 %100 }
  0x88   : > { %v82_v29 = vadd.f32 %v180_v26, %v70_v25  ;;  %vm103_vm6 = vcmp.eq.f32.partialorder %v101_v28, %v276_v0  ;;  %vm115_vm7 = vcmp.eq.f32.partialorder %v113_v27, %v276_v0 }
  0x89   : > { %v186_v32 = vsel %vm103_vm6, 1.0, %v256_v14  ;;  %v189_v34 = vsel %vm115_vm7, 1.0, %v256_v14 }
  0x8a   : > { %v94_v31 = vadd.f32 %v183_v30, %v82_v29 }
  0x8c   : > { %v106_v33 = vadd.f32 %v186_v32, %v94_v31  ;;  %20 = sbr.rel (!%p18_p0) target bundleno = 2 (0x2), region = 43 }
  0x8e   : > { %v118_v35 = vadd.f32 %v189_v34, %v106_v33  }
  0x90   : > { %v309_v1 = vmov %v118_v35  ;;  %119 = vst [vmem:[#allocation2] sm:$0xff] (%p18_p0), %v118_v35 }
  0x91   :  { %130 = dma.vmem_to_hbm [thread:$0]  %s126_s19, 128, %s128_s17, [#allocation3]  }
  0x92   :  { %245 = dma.done.wait [#allocation3], 128  }
  0x93   :  { %246 = vsyncadd [#allocation3], 4294967168 }
  0x94   :  { %135 = vsyncpa [#allocation3], 1 }

</bundles_post_ra>
